<compile_context>
chip_gen: v7x
topology: tpu7x:2x2x1
jax: 0.10.0
libtpu: 0.0.40
codegen_flags: <defaults>
</compile_context>

<pallas_src>
import functools

import jax
import jax.numpy as jnp
from jax.experimental import pallas as pl
from jax.experimental.pallas import tpu as pltpu

LANE = 128          # lane width: feature dims padded to a multiple of this
SUBLANE = 8         # f32 sublane granularity for batch tiles
_MAX_TILE_B = 512   # upper bound on batch rows per grid step


def _round_up(x, m):
    return (x + m - 1) // m * m


def _tpu_vmem_and_cores():
    """Best-effort trace-time query: per-core VMEM capacity and TC count."""
    vmem_cap = 128 << 20
    try:
        info = pltpu.get_tpu_info()
        vmem_cap = int(getattr(info, "vmem_capacity_bytes", vmem_cap))
    except Exception:
        pass
    kind = ""
    try:
        kind = jax.devices()[0].device_kind.lower()
    except Exception:
        pass
    # v7x: 2 TensorCores per chip, only 64 MiB VMEM per core.
    num_tc = 2 if ("v7" in kind or "7x" in kind or vmem_cap <= (96 << 20)) else 1
    return vmem_cap, num_tc


def gaussian_decoder_kernel(z_ref, w1_ref, b1_ref, w2_ref, b2_ref,
                            w3_ref, b3_ref, mu_ref, logvar_ref, *, d_pad):
    cdt = w1_ref.dtype  # MXU input dtype (bf16); accumulation stays f32

    # fc1 + ReLU
    h = jnp.dot(z_ref[...], w1_ref[...], preferred_element_type=jnp.float32)
    h = jnp.maximum(h + b1_ref[...], 0.0).astype(cdt)
    # fc2 + ReLU
    h = jnp.dot(h, w2_ref[...], preferred_element_type=jnp.float32)
    h = jnp.maximum(h + b2_ref[...], 0.0).astype(cdt)
    # fc3: one wide dot over the merged [mu | logvar] weight. d_pad is a
    # multiple of 128, so the split below is a whole-vreg, lane-aligned slice.
    h3 = jnp.dot(h, w3_ref[...], preferred_element_type=jnp.float32) + b3_ref[...]
    mu = h3[:, :d_pad]
    lv = h3[:, d_pad:]

    # Numerically stable sigmoid on the EUP: sigmoid(x) = 0.5*(tanh(x/2)+1);
    # no f32 exp overflow path, VALU stays free for bias/ReLU work.
    mu_ref[...] = (0.5 * (jnp.tanh(0.5 * mu) + 1.0)).astype(mu_ref.dtype)
    # hardtanh(min_val=-4.5, max_val=0.0)
    logvar_ref[...] = jnp.clip(lv, -4.5, 0.0).astype(logvar_ref.dtype)


def gaussian_decoder(z, params, *, compute_dtype=jnp.bfloat16,
                     out_dtype=jnp.float32, tile_b=None):
    """z: (B, z_dim) float32. params: dict of fc{1,2,3} weights/biases."""
    B, z_dim = z.shape
    w1, b1 = params["w1"], params["b1"]      # (z_dim, H), (1, H)
    w2, b2 = params["w2"], params["b2"]      # (H, H),     (1, H)
    w3, b3 = params["w3"], params["b3"]      # (H, 2*D),   (1, 2*D)
    hidden = w1.shape[1]
    input_dim = w3.shape[1] // 2
    d_pad = _round_up(input_dim, LANE)       # lane-dense output width per head
    h_pad = _round_up(hidden, LANE)          # lane-dense hidden width

    # ---- zero-pad hidden / output feature dims (padding is mathematically
    # inert: zero weight rows/cols + zero bias keep padded activations at 0).
    def pad_to(a, shape):
        return jnp.pad(a, [(0, t - s) for s, t in zip(a.shape, shape)])

    w1p = pad_to(w1, (z_dim, h_pad))
    b1p = pad_to(b1, (1, h_pad))
    w2p = pad_to(w2, (h_pad, h_pad))
    b2p = pad_to(b2, (1, h_pad))
    # fc3: lane-pad each head, re-merge so a single dot emits [mu | logvar]
    # with a lane-aligned boundary at column d_pad.
    w3m = pad_to(w3[:, :input_dim], (h_pad, d_pad))
    w3v = pad_to(w3[:, input_dim:], (h_pad, d_pad))
    b3m = pad_to(b3[:, :input_dim], (1, d_pad))
    b3v = pad_to(b3[:, input_dim:], (1, d_pad))
    w3p = jnp.concatenate([w3m, w3v], axis=1)        # (h_pad, 2*d_pad)
    b3p = jnp.concatenate([b3m, b3v], axis=1)        # (1, 2*d_pad)

    # bf16 weights halve HBM/VMEM traffic and double MXU rate; biases stay f32.
    w1c = w1p.astype(compute_dtype)
    w2c = w2p.astype(compute_dtype)
    w3c = w3p.astype(compute_dtype)
    b1f = b1p.astype(jnp.float32)
    b2f = b2p.astype(jnp.float32)
    b3f = b3p.astype(jnp.float32)

    cb = jnp.dtype(compute_dtype).itemsize
    ob = jnp.dtype(out_dtype).itemsize

    vmem_cap, num_tc = _tpu_vmem_and_cores()
    vmem_budget = int(0.85 * vmem_cap)

    # Single-buffered resident weights + double-buffered per-row I/O tiles
    # + f32 intermediates.
    resident_bytes = ((w1c.size + w2c.size + w3c.size) * cb
                      + (b1f.size + b2f.size + b3f.size) * 4)
    per_row_bytes = (2 * z_dim * cb               # z tile (double-buffered)
                     + 2 * 2 * d_pad * ob         # mu+logvar tiles (double-buffered)
                     + 2 * h_pad * (4 + cb)       # fc1/fc2 activations (f32 + bf16)
                     + 2 * d_pad * 4)             # merged fc3 f32 result

    if tile_b is None:
        avail = vmem_budget - resident_bytes - (4 << 20)
        if avail > 0:
            max_tile_vmem = max(SUBLANE,
                                (avail // max(per_row_bytes, 1)) // SUBLANE * SUBLANE)
        else:
            # TODO(synk): resident weights alone exceed the VMEM budget; a real
            # fix would tile the hidden/output feature dims as well.
            max_tile_vmem = SUBLANE
        tile_b = min(_MAX_TILE_B, max_tile_vmem, _round_up(B, SUBLANE))
        # v7x has two TensorCores: give each at least one grid step.
        if num_tc >= 2 and B >= 16:
            tile_b = min(tile_b, _round_up(pl.cdiv(B, num_tc), SUBLANE))
        tile_b = max(SUBLANE, tile_b // SUBLANE * SUBLANE)

    # Pad the batch (instead of falling back to a whole-batch block) so every
    # store is sublane-dense; padded rows are stripped below.
    B_pad = _round_up(B, tile_b)
    zc = z.astype(compute_dtype)
    if B_pad != B:
        zc = jnp.pad(zc, ((0, B_pad - B), (0, 0)))
    grid = (B_pad // tile_b,)

    def invariant(a):
        # Grid-invariant operand: constant index_map, never re-fetched, so one
        # VMEM copy (Buffered(1)) is enough instead of the default 2.
        imap = lambda i, _nd=a.ndim: (0,) * _nd
        try:
            return pl.BlockSpec(a.shape, imap, pipeline_mode=pl.Buffered(1))
        except (TypeError, AttributeError):
            return pl.BlockSpec(a.shape, imap)

    flops = 2 * B_pad * (z_dim * h_pad + h_pad * h_pad + h_pad * 2 * d_pad)
    cost = pl.CostEstimate(
        flops=int(flops),
        transcendentals=int(B_pad * d_pad),        # tanh in the sigmoid
        bytes_accessed=int(resident_bytes + B_pad * z_dim * cb
                           + 2 * B_pad * d_pad * ob),
    )

    kernel = functools.partial(gaussian_decoder_kernel, d_pad=d_pad)
    mu_p, lv_p = pl.pallas_call(
        kernel,
        out_shape=(
            jax.ShapeDtypeStruct((B_pad, d_pad), out_dtype),   # mu (padded)
            jax.ShapeDtypeStruct((B_pad, d_pad), out_dtype),   # logvar (padded)
        ),
        grid_spec=pltpu.PrefetchScalarGridSpec(
            num_scalar_prefetch=0,
            grid=grid,
            in_specs=[
                pl.BlockSpec((tile_b, z_dim), lambda i: (i, 0)),
                invariant(w1c), invariant(b1f),
                invariant(w2c), invariant(b2f),
                invariant(w3c), invariant(b3f),
            ],
            out_specs=[
                pl.BlockSpec((tile_b, d_pad), lambda i: (i, 0)),
                pl.BlockSpec((tile_b, d_pad), lambda i: (i, 0)),
            ],
        ),
        compiler_params=pltpu.CompilerParams(
            dimension_semantics=("parallel",),
            vmem_limit_bytes=int(max(vmem_budget, 16 << 20)),
        ),
        cost_estimate=cost,
    )(zc, w1c, b1f, w2c, b2f, w3c, b3f)

    # Strip batch + lane padding (skipped entirely when nothing was padded).
    if B_pad != B or d_pad != input_dim:
        return mu_p[:B, :input_dim], lv_p[:B, :input_dim]
    return mu_p, lv_p


def init_params(key, input_dim, z_dim, hidden_dim):
    """Deterministic init; weights stored as (in, out) = transposed PyTorch layout."""
    ks = jax.random.split(key, 6)

    def linear(kw, kb, fan_in, fan_out):
        bound = 1.0 / jnp.sqrt(fan_in)
        w = jax.random.uniform(kw, (fan_in, fan_out), jnp.float32, -bound, bound)
        b = jax.random.uniform(kb, (1, fan_out), jnp.float32, -bound, bound)
        return w, b

    w1, b1 = linear(ks[0], ks[1], z_dim, hidden_dim)
    w2, b2 = linear(ks[2], ks[3], hidden_dim, hidden_dim)
    w3, b3 = linear(ks[4], ks[5], hidden_dim, input_dim * 2)
    return {"w1": w1, "b1": b1, "w2": w2, "b2": b2, "w3": w3, "b3": b3}


def reference(z, p, compute_dtype=jnp.bfloat16):
    """Pure-JAX reference following the same bf16-compute / f32-accumulate path."""
    cdt = compute_dtype
    h = jnp.dot(z.astype(cdt), p["w1"].astype(cdt),
                preferred_element_type=jnp.float32) + p["b1"]
    h = jnp.maximum(h, 0.0).astype(cdt)
    h = jnp.dot(h, p["w2"].astype(cdt),
                preferred_element_type=jnp.float32) + p["b2"]
    h = jnp.maximum(h, 0.0).astype(cdt)
    h = jnp.dot(h, p["w3"].astype(cdt),
                preferred_element_type=jnp.float32) + p["b3"]
    d = p["w3"].shape[1] // 2
    mu = jax.nn.sigmoid(h[:, :d])
    logvar = jnp.clip(h[:, d:], -4.5, 0.0)
    return mu, logvar


if __name__ == "__main__":
    input_dim, z_dim, hidden_dim = 16, 8, 32
    batch = 16

    key = jax.random.PRNGKey(0)
    kz, kp = jax.random.split(key)
    z = jax.random.normal(kz, (batch, z_dim), jnp.float32)
    params = init_params(kp, input_dim, z_dim, hidden_dim)

    fwd = jax.jit(functools.partial(gaussian_decoder, compute_dtype=jnp.bfloat16))
    mu, logvar = fwd(z, params)
    jax.block_until_ready((mu, logvar))

    mu_ref, lv_ref = reference(z, params)
    assert mu.shape == (batch, input_dim) and logvar.shape == (batch, input_dim)
    # bf16 MXU path -> compare at loose-but-tight-enough tolerance.
    assert jnp.allclose(mu, mu_ref, atol=1e-2, rtol=1e-2)
    assert jnp.allclose(logvar, lv_ref, atol=1e-2, rtol=1e-2)
    # hardtanh range check (exact by construction)
    assert bool(jnp.all((logvar >= -4.5) & (logvar <= 0.0)))

    print("KERNEL_OK")
</pallas_src>

<mosaic_0001>
module attributes {stable_mosaic.version = 11 : i64} {
  func.func @gaussian_decoder_kernel(%arg0: i32, %arg1: memref<16x8xbf16, #tpu.memory_space<vmem>>, %arg2: memref<8x128xbf16, #tpu.memory_space<vmem>>, %arg3: memref<1x128xf32, #tpu.memory_space<vmem>>, %arg4: memref<128x128xbf16, #tpu.memory_space<vmem>>, %arg5: memref<1x128xf32, #tpu.memory_space<vmem>>, %arg6: memref<128x256xbf16, #tpu.memory_space<vmem>>, %arg7: memref<1x256xf32, #tpu.memory_space<vmem>>, %arg8: memref<16x128xf32, #tpu.memory_space<vmem>>, %arg9: memref<16x128xf32, #tpu.memory_space<vmem>>) attributes {dimension_semantics = [#tpu.dimension_semantics<parallel>], iteration_bounds = array<i64: 1>, scalar_prefetch = 0 : i64, scratch_operands = 0 : i64, tpu.core_type = #tpu.core_type<tc>, window_params = [{transform_indices = @transform_0, window_bounds = array<i64: 16, 8>}, {pipeline_mode = #tpu.pipeline_mode<synchronous>, transform_indices = @transform_1, window_bounds = array<i64: 8, 128>}, {pipeline_mode = #tpu.pipeline_mode<synchronous>, transform_indices = @transform_2, window_bounds = array<i64: 1, 128>}, {pipeline_mode = #tpu.pipeline_mode<synchronous>, transform_indices = @transform_3, window_bounds = array<i64: 128, 128>}, {pipeline_mode = #tpu.pipeline_mode<synchronous>, transform_indices = @transform_4, window_bounds = array<i64: 1, 128>}, {pipeline_mode = #tpu.pipeline_mode<synchronous>, transform_indices = @transform_5, window_bounds = array<i64: 128, 256>}, {pipeline_mode = #tpu.pipeline_mode<synchronous>, transform_indices = @transform_6, window_bounds = array<i64: 1, 256>}, {transform_indices = @transform_7, window_bounds = array<i64: 16, 128>}, {transform_indices = @transform_8, window_bounds = array<i64: 16, 128>}]} {
    %c0 = arith.constant 0 : index
    %c0_0 = arith.constant 0 : index
    %0 = vector.load %arg1[%c0, %c0_0] : memref<16x8xbf16, #tpu.memory_space<vmem>>, vector<16x8xbf16>
    %c0_1 = arith.constant 0 : index
    %c0_2 = arith.constant 0 : index
    %1 = vector.load %arg2[%c0_1, %c0_2] : memref<8x128xbf16, #tpu.memory_space<vmem>>, vector<8x128xbf16>
    %cst = arith.constant dense<0.000000e+00> : vector<16x128xf32>
    %2 = tpu.matmul %0, %1, %cst {dimension_numbers = #tpu.dot_dimension_numbers<[1], [0], [0], [1], [0, 0, 1, 1], [], []>} : vector<16x8xbf16>, vector<8x128xbf16>, vector<16x128xf32> -> vector<16x128xf32>
    %c0_3 = arith.constant 0 : index
    %c0_4 = arith.constant 0 : index
    %3 = vector.load %arg3[%c0_3, %c0_4] : memref<1x128xf32, #tpu.memory_space<vmem>>, vector<1x128xf32>
    %4 = vector.broadcast %3 : vector<1x128xf32> to vector<16x128xf32>
    %5 = arith.addf %2, %4 : vector<16x128xf32>
    %cst_5 = arith.constant 0.000000e+00 : f32
    %6 = vector.broadcast %cst_5 : f32 to vector<16x128xf32>
    %7 = arith.maximumf %5, %6 : vector<16x128xf32>
    %8 = arith.truncf %7 : vector<16x128xf32> to vector<16x128xbf16>
    %c0_6 = arith.constant 0 : index
    %c0_7 = arith.constant 0 : index
    %9 = vector.load %arg4[%c0_6, %c0_7] : memref<128x128xbf16, #tpu.memory_space<vmem>>, vector<128x128xbf16>
    %cst_8 = arith.constant dense<0.000000e+00> : vector<16x128xf32>
    %10 = tpu.matmul %8, %9, %cst_8 {dimension_numbers = #tpu.dot_dimension_numbers<[1], [0], [0], [1], [0, 0, 1, 1], [], []>} : vector<16x128xbf16>, vector<128x128xbf16>, vector<16x128xf32> -> vector<16x128xf32>
    %c0_9 = arith.constant 0 : index
    %c0_10 = arith.constant 0 : index
    %11 = vector.load %arg5[%c0_9, %c0_10] : memref<1x128xf32, #tpu.memory_space<vmem>>, vector<1x128xf32>
    %12 = vector.broadcast %11 : vector<1x128xf32> to vector<16x128xf32>
    %13 = arith.addf %10, %12 : vector<16x128xf32>
    %cst_11 = arith.constant 0.000000e+00 : f32
    %14 = vector.broadcast %cst_11 : f32 to vector<16x128xf32>
    %15 = arith.maximumf %13, %14 : vector<16x128xf32>
    %16 = arith.truncf %15 : vector<16x128xf32> to vector<16x128xbf16>
    %c0_12 = arith.constant 0 : index
    %c0_13 = arith.constant 0 : index
    %17 = vector.load %arg6[%c0_12, %c0_13] : memref<128x256xbf16, #tpu.memory_space<vmem>>, vector<128x256xbf16>
    %cst_14 = arith.constant dense<0.000000e+00> : vector<16x256xf32>
    %18 = tpu.matmul %16, %17, %cst_14 {dimension_numbers = #tpu.dot_dimension_numbers<[1], [0], [0], [1], [0, 0, 1, 1], [], []>} : vector<16x128xbf16>, vector<128x256xbf16>, vector<16x256xf32> -> vector<16x256xf32>
    %c0_15 = arith.constant 0 : index
    %c0_16 = arith.constant 0 : index
    %19 = vector.load %arg7[%c0_15, %c0_16] : memref<1x256xf32, #tpu.memory_space<vmem>>, vector<1x256xf32>
    %20 = vector.broadcast %19 : vector<1x256xf32> to vector<16x256xf32>
    %21 = arith.addf %18, %20 : vector<16x256xf32>
    %22 = vector.extract_strided_slice %21 {offsets = [0, 0], sizes = [16, 128], strides = [1, 1]} : vector<16x256xf32> to vector<16x128xf32>
    %23 = vector.extract_strided_slice %21 {offsets = [0, 128], sizes = [16, 128], strides = [1, 1]} : vector<16x256xf32> to vector<16x128xf32>
    %cst_17 = arith.constant 5.000000e-01 : f32
    %24 = vector.broadcast %cst_17 : f32 to vector<16x128xf32>
    %25 = arith.mulf %24, %22 : vector<16x128xf32>
    %26 = math.tanh %25 : vector<16x128xf32>
    %cst_18 = arith.constant 1.000000e+00 : f32
    %27 = vector.broadcast %cst_18 : f32 to vector<16x128xf32>
    %28 = arith.addf %26, %27 : vector<16x128xf32>
    %cst_19 = arith.constant 5.000000e-01 : f32
    %29 = vector.broadcast %cst_19 : f32 to vector<16x128xf32>
    %30 = arith.mulf %29, %28 : vector<16x128xf32>
    %c0_20 = arith.constant 0 : index
    %c0_21 = arith.constant 0 : index
    %31 = vector.load %arg8[%c0_20, %c0_21] : memref<16x128xf32, #tpu.memory_space<vmem>>, vector<16x128xf32>
    tpu.vector_store %arg8[%c0_20, %c0_21], %30 {strides = array<i32>} : memref<16x128xf32, #tpu.memory_space<vmem>>, vector<16x128xf32>,
    %cst_22 = arith.constant -4.500000e+00 : f32
    %cst_23 = arith.constant 0.000000e+00 : f32
    %32 = vector.broadcast %cst_22 : f32 to vector<16x128xf32>
    %33 = arith.maximumf %32, %23 : vector<16x128xf32>
    %34 = vector.broadcast %cst_23 : f32 to vector<16x128xf32>
    %35 = arith.minimumf %34, %33 : vector<16x128xf32>
    %c0_24 = arith.constant 0 : index
    %c0_25 = arith.constant 0 : index
    %36 = vector.load %arg9[%c0_24, %c0_25] : memref<16x128xf32, #tpu.memory_space<vmem>>, vector<16x128xf32>
    tpu.vector_store %arg9[%c0_24, %c0_25], %35 {strides = array<i32>} : memref<16x128xf32, #tpu.memory_space<vmem>>, vector<16x128xf32>,
    return
  }
  func.func @transform_0(%arg0: i32) -> (i32, i32) {
    %c0_i32 = arith.constant 0 : i32
    %c0_i32_0 = arith.constant 0 : i32
    return %arg0, %c0_i32 : i32, i32
  }
  func.func @transform_1(%arg0: i32) -> (i32, i32) {
    %c0_i32 = arith.constant 0 : i32
    %c0_i32_0 = arith.constant 0 : i32
    %c0_i32_1 = arith.constant 0 : i32
    return %c0_i32, %c0_i32_0 : i32, i32
  }
  func.func @transform_2(%arg0: i32) -> (i32, i32) {
    %c0_i32 = arith.constant 0 : i32
    %c0_i32_0 = arith.constant 0 : i32
    %c0_i32_1 = arith.constant 0 : i32
    return %c0_i32, %c0_i32_0 : i32, i32
  }
  func.func @transform_3(%arg0: i32) -> (i32, i32) {
    %c0_i32 = arith.constant 0 : i32
    %c0_i32_0 = arith.constant 0 : i32
    %c0_i32_1 = arith.constant 0 : i32
    return %c0_i32, %c0_i32_0 : i32, i32
  }
  func.func @transform_4(%arg0: i32) -> (i32, i32) {
    %c0_i32 = arith.constant 0 : i32
    %c0_i32_0 = arith.constant 0 : i32
    %c0_i32_1 = arith.constant 0 : i32
    return %c0_i32, %c0_i32_0 : i32, i32
  }
  func.func @transform_5(%arg0: i32) -> (i32, i32) {
    %c0_i32 = arith.constant 0 : i32
    %c0_i32_0 = arith.constant 0 : i32
    %c0_i32_1 = arith.constant 0 : i32
    return %c0_i32, %c0_i32_0 : i32, i32
  }
  func.func @transform_6(%arg0: i32) -> (i32, i32) {
    %c0_i32 = arith.constant 0 : i32
    %c0_i32_0 = arith.constant 0 : i32
    %c0_i32_1 = arith.constant 0 : i32
    return %c0_i32, %c0_i32_0 : i32, i32
  }
  func.func @transform_7(%arg0: i32) -> (i32, i32) {
    %c0_i32 = arith.constant 0 : i32
    %c0_i32_0 = arith.constant 0 : i32
    return %arg0, %c0_i32 : i32, i32
  }
  func.func @transform_8(%arg0: i32) -> (i32, i32) {
    %c0_i32 = arith.constant 0 : i32
    %c0_i32_0 = arith.constant 0 : i32
    return %arg0, %c0_i32 : i32, i32
  }
}

</mosaic_0001>

<bundles_post_ra>
// kernel: gaussian_decoder.1
= control target key start
LH: loop header
LB: loop body
LE: loop exit
PB: predicated region body
PF: predicated region fallthrough
CT: control target
= control target key end

     0   :  { %14 = vsyncpa [#allocation3], 0  ;;  %s1015_s0 = inlined_call_operand.hbm [shape: bf16[16,8], index: 0, kind: input, shape index: {}]   ;;  %s1016_s1 = inlined_call_operand.hbm [shape: bf16[8,128], index: 1, kind: input, shape index: {}]   ;;  %s1017_s2 = inlined_call_operand.hbm [shape: f32[1,128], index: 2, kind: input, shape index: {}]   ;;  %s1018_s3 = inlined_call_operand.hbm [shape: bf16[128,128], index: 3, kind: input, shape index: {}]   ;;  %s1019_s4 = inlined_call_operand.hbm [shape: f32[1,128], index: 4, kind: input, shape index: {}]   ;;  %s1020_s5 = inlined_call_operand.hbm [shape: bf16[128,256], index: 5, kind: input, shape index: {}]   ;;  %s1021_s6 = inlined_call_operand.hbm [shape: f32[1,256], index: 6, kind: input, shape index: {}]   ;;  %s1022_s7 = inlined_call_operand.hbm [shape: f32[16,128], index: 7, kind: output, shape index: {0}]   ;;  %s1023_s8 = inlined_call_operand.hbm [shape: f32[16,128], index: 8, kind: output, shape index: {1}]  }
   0x1   :  { %15 = vsyncpa [#allocation6], 0 }
   0x2   :  { %16 = vsyncpa [#allocation9], 0 }
   0x3   :  { %17 = vsyncpa [#allocation12], 0 }
   0x4   :  { %18 = vsyncpa [#allocation4], 0 }
   0x5   :  { %19 = vsyncpa [#allocation16], 0  ;;  %s831_s27 = smov [#allocation5]   ;;  %s621_s9 = scalar_lea.hbm %s1016_s1, 64 }
   0x6   :  { %s38_s28 = sshll.u32 %s831_s27, 4  ;;  %p622_p0 = scmp.ne.s32.totalorder %s1016_s1, %s621_s9  ;;  %s39_s28 = int_to_ptr.vmem [resolvable:$true] %s38_s28 }
   0x7   :  { %p625_p1 = scmp.lt.u32.totalorder %s621_s9, %s1016_s1 }
   0x9   :  { %p627_p2 = pnand %p625_p1, %p622_p0 }
   0xb   :  { %630 = shalt.err (!%p627_p2)
}
   0xc   :  { %s631_s14 = scalar_lea.vmem %s39_s28, 64  ;;  %p636_p4 = scmp.lt.s32.totalorder %s39_s28, %s39_s28 }
   0xd   :  { %p632_p3 = scmp.ne.s32.totalorder %s39_s28, %s631_s14  ;;  %p637_p5 = scmp.lt.s32.totalorder %s631_s14, %s631_s14 }
   0xf   :  { %p638_p6 = por %p637_p5, %p636_p4 }
  0x11   :  { %p639_p7 = pnand %p638_p6, %p632_p3 }
  0x13   :  { %642 = shalt.err (!%p639_p7)
}
  0x14   :  { %41 = dma.hbm_to_vmem [thread:$0]  %s1016_s1, 64, %s39_s28, [#allocation6]  }
  0x15   :  { %s832_s17 = smov [#allocation8]   ;;  %s833_s19 = smov [#allocation11]  }
  0x16   :  { %s57_s18 = sshll.u32 %s832_s17, 4  ;;  %s79_s20 = sshll.u32 %s833_s19, 4  ;;  %s58_s18 = int_to_ptr.vmem [resolvable:$true] %s57_s18  ;;  %s80_s20 = int_to_ptr.vmem [resolvable:$true] %s79_s20 }
  0x17   :  { %s643_s23 = scalar_lea.hbm %s1018_s3, 1024 }
  0x18   :  { %p644_p8 = scmp.ne.s32.totalorder %s1018_s3, %s643_s23  ;;  %p647_p9 = scmp.lt.u32.totalorder %s643_s23, %s1018_s3 }
  0x1a   :  { %p649_p10 = pnand %p647_p9, %p644_p8 }
  0x1c   :  { %652 = shalt.err (!%p649_p10)
}
  0x1d   :  { %s653_s1 = scalar_lea.vmem %s58_s18, 1024  ;;  %p658_p12 = scmp.lt.s32.totalorder %s58_s18, %s58_s18 }
  0x1e   :  { %p654_p11 = scmp.ne.s32.totalorder %s58_s18, %s653_s1  ;;  %p659_p13 = scmp.lt.s32.totalorder %s653_s1, %s653_s1 }
  0x20   :  { %p660_p0 = por %p659_p13, %p658_p12 }
  0x22   :  { %p661_p1 = pnand %p660_p0, %p654_p11 }
  0x24   :  { %664 = shalt.err (!%p661_p1)
}
  0x25   :  { %s834_s28 = smov 64   ;;  %s835_s29 = smov 4  }
  0x26   :  { %63 = dma.hbm_to_vmem [thread:$0]  %s1018_s3, 1024, %s58_s18, [#allocation9], %s834_s28, %s834_s28, %s835_s29  }
  0x27   :  { %s665_s12 = scalar_lea.hbm %s1020_s5, 2048 }
  0x28   :  { %p666_p2 = scmp.ne.s32.totalorder %s1020_s5, %s665_s12  ;;  %p669_p3 = scmp.lt.u32.totalorder %s665_s12, %s1020_s5 }
  0x2a   :  { %p671_p4 = pnand %p669_p3, %p666_p2 }
  0x2c   :  { %674 = shalt.err (!%p671_p4)
}
  0x2d   :  { %s675_s17 = scalar_lea.vmem %s80_s20, 2048  ;;  %p680_p6 = scmp.lt.s32.totalorder %s80_s20, %s80_s20 }
  0x2e   :  { %p676_p5 = scmp.ne.s32.totalorder %s80_s20, %s675_s17  ;;  %p681_p7 = scmp.lt.s32.totalorder %s675_s17, %s675_s17 }
  0x30   :  { %p682_p8 = por %p681_p7, %p680_p6 }
  0x32   :  { %p683_p9 = pnand %p682_p8, %p676_p5 }
  0x34   :  { %686 = shalt.err (!%p683_p9)
}
  0x35   :  { %s836_s3 = smov 128   ;;  %s837_s18 = smov 8  }
  0x36   :  { %85 = dma.hbm_to_vmem [thread:$0]  %s1020_s5, 2048, %s80_s20, [#allocation12], %s836_s3, %s836_s3, %s837_s18  }
  0x37   :  { %s838_s22 = smov [#allocation2]   ;;  %s839_s24 = smov [#allocation7]  }
  0x38   :  { %s25_s23 = sshll.u32 %s838_s22, 4  ;;  %s48_s25 = sshll.u32 %s839_s24, 4  ;;  %s26_s23 = int_to_ptr.vmem [resolvable:$true] %s25_s23  ;;  %s49_s25 = int_to_ptr.vmem [resolvable:$true] %s48_s25 }
  0x39   :  { %s687_s1 = scalar_lea.hbm %s1015_s0, 128 }
  0x3a   :  { %p688_p10 = scmp.ne.s32.totalorder %s1015_s0, %s687_s1  ;;  %p691_p11 = scmp.lt.u32.totalorder %s687_s1, %s1015_s0 }
  0x3c   :  { %p693_p12 = pnand %p691_p11, %p688_p10 }
  0x3e   :  { %696 = shalt.err (!%p693_p12)
}
  0x3f   :  { %s697_s5 = scalar_lea.vmem %s26_s23, 128  ;;  %p702_p0 = scmp.lt.s32.totalorder %s26_s23, %s26_s23 }
  0x40   :  { %p698_p13 = scmp.ne.s32.totalorder %s26_s23, %s697_s5  ;;  %p703_p1 = scmp.lt.s32.totalorder %s697_s5, %s697_s5 }
  0x42   :  { %p704_p2 = por %p703_p1, %p702_p0 }
  0x44   :  { %p705_p3 = pnand %p704_p2, %p698_p13 }
  0x46   :  { %708 = shalt.err (!%p705_p3)
}
  0x47   :  { %31 = dma.hbm_to_vmem [thread:$0]  %s1015_s0, 128, %s26_s23, [#allocation3], %s834_s28, %s834_s28, %s835_s29  }
  0x48   :  { %s709_s15 = scalar_lea.hbm %s1017_s2, 16 }
  0x49   :  { %p710_p4 = scmp.ne.s32.totalorder %s1017_s2, %s709_s15  ;;  %p713_p5 = scmp.lt.u32.totalorder %s709_s15, %s1017_s2 }
  0x4b   :  { %p715_p6 = pnand %p713_p5, %p710_p4 }
  0x4d   :  { %718 = shalt.err (!%p715_p6)
}
  0x4e   :  { %s719_s22 = scalar_lea.vmem %s49_s25, 16  ;;  %s723_s24 = scalar_lea.vmem %s49_s25, 32 }
  0x4f   :  { %p720_p7 = scmp.ne.s32.totalorder %s49_s25, %s719_s22  ;;  %p724_p8 = scmp.lt.s32.totalorder %s49_s25, %s49_s25 }
  0x50   :  { %p725_p9 = scmp.lt.s32.totalorder %s723_s24, %s719_s22 }
  0x52   :  { %p726_p10 = por %p725_p9, %p724_p8 }
  0x54   :  { %p727_p11 = pnand %p726_p10, %p720_p7 }
  0x56   :  { %730 = shalt.err (!%p727_p11)
}
  0x57   :  { %51 = dma.hbm_to_vmem [thread:$0]  %s1017_s2, 16, %s49_s25, [#allocation6]  }
  0x58   :  { %s840_s29 = smov [#allocation10]   ;;  %s841_s26 = smov [#allocation13]  }
  0x59   :  { %s70_s23 = sshll.u32 %s840_s29, 4  ;;  %s92_s27 = sshll.u32 %s841_s26, 4  ;;  %s71_s23 = int_to_ptr.vmem [resolvable:$true] %s70_s23  ;;  %s93_s27 = int_to_ptr.vmem [resolvable:$true] %s92_s27 }
  0x5a   :  { %s731_s9 = scalar_lea.hbm %s1019_s4, 16 }
  0x5b   :  { %p732_p12 = scmp.ne.s32.totalorder %s1019_s4, %s731_s9  ;;  %p735_p13 = scmp.lt.u32.totalorder %s731_s9, %s1019_s4 }
  0x5d   :  { %p737_p0 = pnand %p735_p13, %p732_p12 }
  0x5f   :  { %740 = shalt.err (!%p737_p0)
}
  0x60   :  { %s741_s2 = scalar_lea.vmem %s71_s23, 16  ;;  %s745_s25 = scalar_lea.vmem %s71_s23, 32 }
  0x61   :  { %p742_p1 = scmp.ne.s32.totalorder %s71_s23, %s741_s2  ;;  %p746_p2 = scmp.lt.s32.totalorder %s71_s23, %s71_s23 }
  0x62   :  { %p747_p3 = scmp.lt.s32.totalorder %s745_s25, %s741_s2 }
  0x64   :  { %p748_p4 = por %p747_p3, %p746_p2 }
  0x66   :  { %p749_p5 = pnand %p748_p4, %p742_p1 }
  0x68   :  { %752 = shalt.err (!%p749_p5)
}
  0x69   :  { %73 = dma.hbm_to_vmem [thread:$0]  %s1019_s4, 16, %s71_s23, [#allocation9]  }
  0x6a   :  { %s753_s16 = scalar_lea.hbm %s1021_s6, 32 }
  0x6b   :  { %p754_p6 = scmp.ne.s32.totalorder %s1021_s6, %s753_s16  ;;  %p757_p7 = scmp.lt.u32.totalorder %s753_s16, %s1021_s6 }
  0x6d   :  { %p759_p8 = pnand %p757_p7, %p754_p6 }
  0x6f   :  { %762 = shalt.err (!%p759_p8)
}
  0x70   :  { %s763_s24 = scalar_lea.vmem %s93_s27, 32  ;;  %p768_p10 = scmp.lt.s32.totalorder %s93_s27, %s93_s27 }
  0x71   :  { %p764_p9 = scmp.ne.s32.totalorder %s93_s27, %s763_s24  ;;  %p769_p11 = scmp.lt.s32.totalorder %s763_s24, %s763_s24 }
  0x73   :  { %p770_p12 = por %p769_p11, %p768_p10 }
  0x75   :  { %p771_p13 = pnand %p770_p12, %p764_p9 }
  0x77   :  { %774 = shalt.err (!%p771_p13)
}
  0x78   :  { %95 = dma.hbm_to_vmem [thread:$0]  %s1021_s6, 32, %s93_s27, [#allocation12]  }
  0x79   :  { %819 = dma.done.wait [#allocation3], 128  }
  0x7a   :  { %820 = vsyncadd [#allocation3], 4294967168 }
  0x7b   :  { %821 = dma.done.wait [#allocation6], 80  }
  0x7c   :  { %822 = vsyncadd [#allocation6], 4294967216 }
  0x7d   :  { %823 = dma.done.wait [#allocation9], 1040  }
  0x7e   :  { %824 = vsyncadd [#allocation9], 4294966256 }
  0x7f   :  { %825 = dma.done.wait [#allocation12], 2080  }
  0x80   :  { %826 = vsyncadd [#allocation12], 4294965216  ;;  %v842_v0 = vmov 0.0   ;;  %vm843_vm0 = vmmov 0   ;;  %vm137_vm1 = vcmask 1043456   ;;  %v584_v3 = vld [vmem:[#allocation2] sm:$0xff]   ;;  %v318_v49 = vlaneseq }
  0x81   :  { %542 = vmatprep.subr.bf16.mxu0 %v842_v0  ;;  %544 = vmatprep.mubr.msk.bf16.mxu0 %vm843_vm0, %v842_v0  ;;  %v120_v1 = vld [vmem:[#allocation5] sm:$0xf]  ;;  %vm133_vm2 = vcmask 64512   ;;  %v585_v4 = vld [vmem:[#allocation8] sm:$0xff]   ;;  %v586_v5 = vld [vmem:[#allocation8 + $0x8] sm:$0xff]   ;;  %v844_v38 = vmov 0  }
  0x82   :  { %548 = vmatprep.subr.bf16.mxu1 %v842_v0  ;;  %564 = vmatprep.mubr.msk.bf16.mxu1 %vm843_vm0, %v842_v0  ;;  %v139_v2 = vsel %vm137_vm1, %v120_v1, 0  ;;  %v587_v6 = vld [vmem:[#allocation8 + $0x10] sm:$0xff]   ;;  %v588_v7 = vld [vmem:[#allocation8 + $0x18] sm:$0xff]   ;;  %v589_v8 = vld [vmem:[#allocation8 + $0x20] sm:$0xff]   ;;  %v319_v50 = vshrl.u32 %v318_v49, 7  ;;  %s845_s6 = smov [#allocation15]  }
  0x83   :  { %543 = vmatpush3.bf16.msra.mxu0 %v139_v2  ;;  %549 = vmatpush3.bf16.msra.mxu1 %v585_v4  ;;  %v590_v9 = vld [vmem:[#allocation8 + $0x28] sm:$0xff]   ;;  %v591_v10 = vld [vmem:[#allocation8 + $0x30] sm:$0xff]   ;;  %v592_v11 = vld [vmem:[#allocation8 + $0x38] sm:$0xff]   ;;  %s484_s28 = sshll.u32 %s845_s6, 4  ;;  %s485_s28 = int_to_ptr.vmem [resolvable:$true] %s484_s28 }
  0x84   :  { %550 = vmatprep.subr.bf16.mxu1 %v842_v0  ;;  %v593_v12 = vld [vmem:[#allocation11] ss:$8 sps:$4 sm:$0xff]   ;;  %v595_v13 = vld [vmem:[#allocation11 + $0x4] ss:$8 sps:$4 sm:$0xff]   ;;  %v598_v14 = vld [vmem:[#allocation11 + $0x14] ss:$8 sps:$4 sm:$0xff]   ;;  %p780_p1 = scmp.lt.s32.totalorder %s485_s28, %s485_s28 }
  0x85   :  { %408 = vmatprep.subr.bf16.mxu0 %v595_v13  ;;  %v596_v15 = vld [vmem:[#allocation11 + $0x10] ss:$8 sps:$4 sm:$0xff]   ;;  %v601_v16 = vld [vmem:[#allocation11 + $0x24] ss:$8 sps:$4 sm:$0xff]   ;;  %v599_v17 = vld [vmem:[#allocation11 + $0x20] ss:$8 sps:$4 sm:$0xff]  }
  0x86   :  { %545 = vmatmul.mubr.msk.bf16.vlgmr.msra.gmra.mrb[0].mxu0 %vm133_vm2, %v584_v3  ;;  %v604_v18 = vld [vmem:[#allocation11 + $0x34] ss:$8 sps:$4 sm:$0xff]   ;;  %v602_v19 = vld [vmem:[#allocation11 + $0x30] ss:$8 sps:$4 sm:$0xff]   ;;  %v607_v20 = vld [vmem:[#allocation11 + $0x44] ss:$8 sps:$4 sm:$0xff]  }
  0x87   :  { %551 = vmatpush3.bf16.msra.mxu1 %v586_v5  ;;  %409 = vmatpush1.bf16.msra.mxu0 %v593_v12  ;;  %v605_v21 = vld [vmem:[#allocation11 + $0x40] ss:$8 sps:$4 sm:$0xff]   ;;  %v610_v22 = vld [vmem:[#allocation11 + $0x54] ss:$8 sps:$4 sm:$0xff]   ;;  %v608_v23 = vld [vmem:[#allocation11 + $0x50] ss:$8 sps:$4 sm:$0xff]  }
  0x88   :  { %552 = vmatprep.subr.bf16.mxu1 %v842_v0  ;;  %410 = vmatprep.subr.bf16.mxu0 %v598_v14  ;;  %v503_v24 = vld [vmem:[#allocation7] ss:$0 sm:$0xff]  ;;  %v613_v34 = vld [vmem:[#allocation11 + $0x64] ss:$8 sps:$4 sm:$0xff]   ;;  %v611_v35 = vld [vmem:[#allocation11 + $0x60] ss:$8 sps:$4 sm:$0xff]  }
  0x89   :  { %v616_v36 = vld [vmem:[#allocation11 + $0x74] ss:$8 sps:$4 sm:$0xff]   ;;  %v614_v37 = vld [vmem:[#allocation11 + $0x70] ss:$8 sps:$4 sm:$0xff]   ;;  %440 = vmatprep.mubr.bf16.mxu0 %v844_v38  ;;  %v320_v51 = vsub.s32 0, %v319_v50  ;;  %v324_v53 = vsub.s32 1, %v319_v50 }
  0x8a   :  { %v506_v39 = vld [vmem:[#allocation10] ss:$0 sm:$0xff]  ;;  %v316_v52 = vld [vmem:[#allocation13] sm:$0x3]  ;;  %s775_s29 = scalar_lea.vmem %s485_s28, 256 }
  0x8b   :  { %553 = vmatpush3.bf16.msra.mxu1 %v587_v6  ;;  %411 = vmatpush1.bf16.msra.mxu0 %v596_v15  ;;  %v321_v54 = vrot.slane %v316_v52, %v320_v51  ;;  %v325_v55 = vrot.slane %v316_v52, %v324_v53  ;;  %p776_p0 = scmp.ne.s32.totalorder %s485_s28, %s775_s29  ;;  %p781_p2 = scmp.lt.s32.totalorder %s775_s29, %s775_s29 }
  0x8c   :  { %554 = vmatprep.subr.bf16.mxu1 %v842_v0  ;;  %412 = vmatprep.subr.bf16.mxu0 %v601_v16 }
  0x8d   :  { %p782_p3 = por %p781_p2, %p780_p1 }
  0x8f   :  { %555 = vmatpush3.bf16.msra.mxu1 %v588_v7  ;;  %413 = vmatpush1.bf16.msra.mxu0 %v599_v17  ;;  %p783_p4 = pnand %p782_p3, %p776_p0 }
  0x90   :  { %556 = vmatprep.subr.bf16.mxu1 %v842_v0  ;;  %414 = vmatprep.subr.bf16.mxu0 %v604_v18 }
  0x93   :  { %557 = vmatpush3.bf16.msra.mxu1 %v589_v8  ;;  %415 = vmatpush1.bf16.msra.mxu0 %v602_v19 }
  0x94   :  { %558 = vmatprep.subr.bf16.mxu1 %v842_v0  ;;  %416 = vmatprep.subr.bf16.mxu0 %v607_v20 }
  0x97   :  { %559 = vmatpush3.bf16.msra.mxu1 %v590_v9  ;;  %417 = vmatpush1.bf16.msra.mxu0 %v605_v21 }
  0x98   :  { %560 = vmatprep.subr.bf16.mxu1 %v842_v0  ;;  %418 = vmatprep.subr.bf16.mxu0 %v610_v22 }
  0x9b   :  { %561 = vmatpush3.bf16.msra.mxu1 %v591_v10  ;;  %419 = vmatpush1.bf16.msra.mxu0 %v608_v23 }
  0x9c   :  { %562 = vmatprep.subr.bf16.mxu1 %v842_v0  ;;  %420 = vmatprep.subr.bf16.mxu0 %v613_v34 }
  0x9f   :  { %563 = vmatpush3.bf16.msra.mxu1 %v592_v11  ;;  %421 = vmatpush1.bf16.msra.mxu0 %v611_v35 }
  0xa0   :  { %422 = vmatprep.subr.bf16.mxu0 %v616_v36 }
  0xa3   :  { %423 = vmatpush1.bf16.msra.mxu0 %v614_v37 }
 0x159   :  { %v175_v25 = vpop.f32.mrb[0].mxu0 }
 0x15a   :  { %v176_v26 = vadd.f32 %v503_v24, %v175_v25  ;;  %v546_v27 = vpop.f32.mrb[1].mxu0 }
 0x15b   :  { %v178_v28 = vpop.f32.mrb[2].mxu0 }
 0x15c   :  { %v179_v29 = vadd.f32 %v503_v24, %v178_v28  ;;  %v547_v30 = vpop.f32.mrb[3].mxu0  ;;  %v182_v31 = vmax.f32 %v176_v26, 0.0 }
 0x15e   :  { %v183_v32 = vmax.f32 %v179_v29, 0.0 }
 0x160   :  { %v184_v33 = vpack.c.bf16 %v183_v32, %v182_v31 }
 0x162   :  { %565 = vmatmul.mubr.bf16.vlgmr.msra.gmra.mrb[0].mxu1 %v184_v33 }
 0x235   :  { %v290_v40 = vpop.f32.mrb[0].mxu1 }
 0x236   :  { %v291_v41 = vadd.f32 %v506_v39, %v290_v40  ;;  %v566_v42 = vpop.f32.mrb[1].mxu1 }
 0x237   :  { %v293_v43 = vpop.f32.mrb[2].mxu1 }
 0x238   :  { %v294_v44 = vadd.f32 %v506_v39, %v293_v43  ;;  %v567_v45 = vpop.f32.mrb[3].mxu1  ;;  %v297_v46 = vmax.f32 %v291_v41, 0.0 }
 0x23a   :  { %v298_v47 = vmax.f32 %v294_v44, 0.0 }
 0x23c   :  { %v299_v48 = vpack.c.bf16 %v298_v47, %v297_v46 }
 0x23e   :  { %441 = vmatmul.mubr.bf16.vlgmr.msra.gmra.mrb[4].mxu0 %v299_v48 }
 0x311   :  { %v442_v56 = vpop.f32.mrb[4].mxu0 }
 0x312   :  { %v443_v57 = vadd.f32 %v442_v56, %v321_v54  ;;  %v444_v58 = vpop.f32.mrb[5].mxu0 }
 0x313   :  { %v445_v59 = vadd.f32 %v444_v58, %v325_v55  ;;  %v446_v60 = vpop.f32.mrb[6].mxu0 }
 0x314   :  { %v451_v61 = vmul.f32 0.5, %v443_v57  ;;  %v447_v62 = vadd.f32 %v446_v60, %v321_v54  ;;  %v448_v63 = vpop.f32.mrb[7].mxu0 }
 0x315   :  { %v461_v0 = vmax.f32 %v445_v59, -4.5  ;;  %v449_v1 = vadd.f32 %v448_v63, %v325_v55 }
 0x316   :  { %617 = vtanh.f32 %v451_v61  ;;  %v452_v2 = vmul.f32 0.5, %v447_v62 }
 0x317   :  { %v463_v3 = vmin.f32 %v461_v0, 0.0  ;;  %v462_v4 = vmax.f32 %v449_v1, -4.5 }
 0x318   :  { %619 = vtanh.f32 %v452_v2 }
 0x319   :  { %465 = vst [vmem:[#allocation15] sm:$0xff] %v463_v3  ;;  %v464_v5 = vmin.f32 %v462_v4, 0.0 }
 0x31b   :  { %466 = vst [vmem:[#allocation15 + $0x8] sm:$0xff] %v464_v5 }
 0x31c   :  { %786 = shalt.err (!%p783_p4)
}
 0x31d   :  { %s787_s27 = scalar_lea.hbm %s1023_s8, 256 }
 0x31e   :  { %p788_p5 = scmp.ne.s32.totalorder %s1023_s8, %s787_s27  ;;  %p791_p6 = scmp.lt.u32.totalorder %s787_s27, %s1023_s8 }
 0x320   :  { %p793_p7 = pnand %p791_p6, %p788_p5 }
 0x322   :  { %796 = shalt.err (!%p793_p7)
}
 0x323   :  { %490 = dma.vmem_to_hbm [thread:$0]  %s485_s28, 256, %s1023_s8, [#allocation16], %s836_s3, %s836_s3, %s837_s18   ;;  %v618_v6 = vpop.eup %617 }
 0x324   :  { %v455_v7 = vadd.f32 1.0, %v618_v6  ;;  %v620_v8 = vpop.eup %619  ;;  %s846_s20 = smov [#allocation14]  }
 0x325   :  { %s472_s2 = sshll.u32 %s846_s20, 4  ;;  %v456_v10 = vadd.f32 1.0, %v620_v8  ;;  %s473_s2 = int_to_ptr.vmem [resolvable:$true] %s472_s2 }
 0x326   :  { %v457_v9 = vmul.f32 0.5, %v455_v7  ;;  %s797_s25 = scalar_lea.vmem %s473_s2, 256  ;;  %p802_p9 = scmp.lt.s32.totalorder %s473_s2, %s473_s2 }
 0x327   :  { %v458_v11 = vmul.f32 0.5, %v456_v10  ;;  %p798_p8 = scmp.ne.s32.totalorder %s473_s2, %s797_s25  ;;  %p803_p10 = scmp.lt.s32.totalorder %s797_s25, %s797_s25 }
 0x328   :  { %459 = vst [vmem:[#allocation14] sm:$0xff] %v457_v9 }
 0x329   :  { %460 = vst [vmem:[#allocation14 + $0x8] sm:$0xff] %v458_v11  ;;  %p804_p11 = por %p803_p10, %p802_p9 }
 0x32b   :  { %p805_p12 = pnand %p804_p11, %p798_p8 }
 0x32d   :  { %808 = shalt.err (!%p805_p12)
}
 0x32e   :  { %s809_s13 = scalar_lea.hbm %s1022_s7, 256 }
 0x32f   :  { %p810_p13 = scmp.ne.s32.totalorder %s1022_s7, %s809_s13  ;;  %p813_p0 = scmp.lt.u32.totalorder %s809_s13, %s1022_s7 }
 0x331   :  { %p815_p1 = pnand %p813_p0, %p810_p13 }
 0x333   :  { %818 = shalt.err (!%p815_p1)
}
 0x334   :  { %478 = dma.vmem_to_hbm [thread:$0]  %s473_s2, 256, %s1022_s7, [#allocation4], %s836_s3, %s836_s3, %s837_s18  }
 0x335   :  { %827 = dma.done.wait [#allocation4], 256  }
 0x336   :  { %828 = vsyncadd [#allocation4], 4294967040 }
 0x337   :  { %829 = dma.done.wait [#allocation16], 256  }
 0x338   :  { %830 = vsyncadd [#allocation16], 4294967040 }
 0x339   :  { %497 = vsyncpa [#allocation3], 1 }
 0x33a   :  { %498 = vsyncpa [#allocation6], 1 }
 0x33b   :  { %499 = vsyncpa [#allocation9], 1 }
 0x33c   :  { %500 = vsyncpa [#allocation12], 1 }
 0x33d   :  { %501 = vsyncpa [#allocation4], 1 }
 0x33e   :  { %502 = vsyncpa [#allocation16], 1 }

</bundles_post_ra>
